<compile_context>
chip_gen: v7x
topology: tpu7x:2x2x1
jax: 0.10.0
libtpu: 0.0.40
codegen_flags: <defaults>
</compile_context>

<pallas_src>
import jax
import jax.numpy as jnp
from jax.experimental import pallas as pl
from jax.experimental.pallas import tpu as pltpu

_LANE = 128
_LANE_CAP = 2048
_SMALL_BYTES = 4 << 20  # per-operand (promoted dtype): whole-array, no-grid path


def _make_binary_kernel(op, out_dtype):
    def kernel(x_ref, y_ref, o_ref):
        # Promotion happens in-kernel on the VPU (free: this kernel is purely
        # DMA-bound), so mixed-precision operands travel HBM->VMEM at native width.
        o_ref[...] = op(x_ref[...].astype(out_dtype),
                        y_ref[...].astype(out_dtype)).astype(out_dtype)
    return kernel


def _sublane_granularity(*dtypes):
    # f32 -> 8 sublanes, bf16/f16 -> 16, int8/fp8 -> 32 (sub-32-bit packs along sublanes).
    return max(max(8, 32 // jnp.dtype(d).itemsize) for d in dtypes)


def _pick_lane(n, sublane_g, cap=_LANE_CAP):
    """Largest multiple of 128 dividing n, preferring lanes leaving >= sublane_g rows."""
    fallback = None
    lane = cap
    while lane >= _LANE:
        if n % lane == 0:
            if n // lane >= sublane_g:
                return lane
            if fallback is None:
                fallback = lane
        lane -= _LANE
    return fallback  # None iff n % 128 != 0


def _tile_policy():
    """Return (tile_bytes, vmem_limit_bytes) gated by TPU generation."""
    kind = ""
    try:
        kind = jax.devices()[0].device_kind.lower()
    except Exception:
        pass
    if "v7" in kind:
        # 3 specs x 2 bufs x 4 MiB = 24 MiB < v7x's 32 MiB scoped default (64 MiB phys).
        return 4 << 20, None
    if "v6" in kind:
        # 128 MiB physical VMEM; raise the 32 MiB scoped default so 4 MiB tiles
        # double-buffer comfortably.
        return 4 << 20, 64 << 20
    # v5e (16 MiB scoped default) / unknown chip: 2 MiB tiles -> 12 MiB working set.
    return 2 << 20, None


def _round_up(x, m):
    return ((x + m - 1) // m) * m


def _whole_array_call(x2, y2, op, out_dtype):
    # Tiny/mid-size path: whole arrays resident in VMEM, no grid -> no software
    # pipeline prologue/epilogue, no double buffering.
    return pl.pallas_call(
        _make_binary_kernel(op, out_dtype),
        out_shape=jax.ShapeDtypeStruct(x2.shape, out_dtype),
        in_specs=[
            pl.BlockSpec(memory_space=pltpu.MemorySpace.VMEM),
            pl.BlockSpec(memory_space=pltpu.MemorySpace.VMEM),
        ],
        out_specs=pl.BlockSpec(memory_space=pltpu.MemorySpace.VMEM),
    )(x2, y2)


def _tiled_call(x2, y2, op, out_dtype, block_rows, vmem_limit):
    rows, lane = x2.shape
    n = rows * lane
    spec = pl.BlockSpec((block_rows, lane), lambda i: (i, 0))
    bytes_accessed = n * (x2.dtype.itemsize + y2.dtype.itemsize
                          + jnp.dtype(out_dtype).itemsize)
    return pl.pallas_call(
        _make_binary_kernel(op, out_dtype),
        out_shape=jax.ShapeDtypeStruct((rows, lane), out_dtype),
        grid=(pl.cdiv(rows, block_rows),),   # ragged last block handled by Pallas masking
        in_specs=[spec, spec],
        out_specs=spec,
        compiler_params=pltpu.CompilerParams(
            # Independent row blocks: lets v7x's two TensorCores split the grid.
            dimension_semantics=("parallel",),
            vmem_limit_bytes=vmem_limit,
        ),
        cost_estimate=pl.CostEstimate(
            flops=n, transcendentals=0, bytes_accessed=bytes_accessed),
    )(x2, y2)


def operation_test_model(x, y, op=jnp.add):
    """Pallas equivalent of OperationTestModel(layer).forward(x, y), with
    layer = elementwise binary op (default add, matching torch.add)."""
    assert x.shape == y.shape, "this instantiation uses same-shape operands"
    # TODO(synk): broadcastable operand pairs (accepted by torch binary ops) are not
    # handled by this same-shape instantiation.

    # torch binary ops promote mixed dtypes; cast happens inside the kernel.
    out_dtype = jnp.promote_types(x.dtype, y.dtype)
    shape = x.shape
    n = x.size
    out_itemsize = jnp.dtype(out_dtype).itemsize

    sublane_g = _sublane_granularity(x.dtype, y.dtype, out_dtype)
    lane = _pick_lane(n, sublane_g)
    if lane is None:
        # TODO(synk): ragged element counts (n % 128 != 0) fall back to XLA fusion.
        return op(x.astype(out_dtype), y.astype(out_dtype))

    rows = n // lane
    x2 = x.reshape(rows, lane)
    y2 = y.reshape(rows, lane)

    if n * out_itemsize <= _SMALL_BYTES:
        out2 = _whole_array_call(x2, y2, op, out_dtype)
    else:
        # HBM-bandwidth-bound sizes: row-tiled pipeline, tile size gated per chip.
        tile_bytes, vmem_limit = _tile_policy()
        block_rows = max(sublane_g,
                         (tile_bytes // (lane * out_itemsize)) // sublane_g * sublane_g)
        block_rows = min(block_rows, _round_up(rows, sublane_g))
        out2 = _tiled_call(x2, y2, op, out_dtype, block_rows, vmem_limit)

    return out2.reshape(shape)


if __name__ == "__main__":
    key = jax.random.PRNGKey(0)
    kx, ky = jax.random.split(key)

    # Small NCHW shape consistent with the layer-test harness.
    x = jax.random.normal(kx, (2, 4, 16, 16), dtype=jnp.float32)
    y = jax.random.normal(ky, (2, 4, 16, 16), dtype=jnp.float32)
    ref = x + y
    out = jax.block_until_ready(operation_test_model(x, y))
    assert out.shape == ref.shape and out.dtype == ref.dtype
    assert jnp.allclose(out, ref, atol=1e-6, rtol=1e-6)

    # Large input: exercises the generation-gated tiled path (8 MiB/operand, f32).
    xb = jax.random.normal(kx, (8, 64, 64, 64), dtype=jnp.float32)
    yb = jax.random.normal(ky, (8, 64, 64, 64), dtype=jnp.float32)
    outb = jax.block_until_ready(operation_test_model(xb, yb))
    assert jnp.allclose(outb, xb + yb, atol=1e-6, rtol=1e-6)

    # Awkward row count: exercises the cdiv grid with a ragged last block.
    xr = jax.random.normal(kx, (5, 64, 64, 64), dtype=jnp.float32)
    yr = jax.random.normal(ky, (5, 64, 64, 64), dtype=jnp.float32)
    outr = jax.block_until_ready(operation_test_model(xr, yr))
    assert jnp.allclose(outr, xr + yr, atol=1e-6, rtol=1e-6)

    # Mixed precision: promotion happens in-kernel; operand read at native bf16 width.
    ym = yb.astype(jnp.bfloat16)
    outm = jax.block_until_ready(operation_test_model(xb, ym))
    assert outm.dtype == jnp.promote_types(xb.dtype, ym.dtype)
    assert jnp.allclose(outm, xb + ym.astype(jnp.float32), atol=1e-5, rtol=1e-5)

    print("KERNEL_OK")
</pallas_src>

<mosaic_0001>
module attributes {stable_mosaic.version = 11 : i64} {
  func.func @kernel(%arg0: memref<8x256xf32, #tpu.memory_space<vmem>>, %arg1: memref<8x256xf32, #tpu.memory_space<vmem>>, %arg2: memref<8x256xf32, #tpu.memory_space<vmem>>) attributes {dimension_semantics = [], scalar_prefetch = 0 : i64, scratch_operands = 0 : i64, tpu.core_type = #tpu.core_type<tc>} {
    %c0 = arith.constant 0 : index
    %c0_0 = arith.constant 0 : index
    %0 = vector.load %arg0[%c0, %c0_0] : memref<8x256xf32, #tpu.memory_space<vmem>>, vector<8x256xf32>
    %c0_1 = arith.constant 0 : index
    %c0_2 = arith.constant 0 : index
    %1 = vector.load %arg1[%c0_1, %c0_2] : memref<8x256xf32, #tpu.memory_space<vmem>>, vector<8x256xf32>
    %2 = arith.addf %0, %1 : vector<8x256xf32>
    %c0_3 = arith.constant 0 : index
    %c0_4 = arith.constant 0 : index
    %3 = vector.load %arg2[%c0_3, %c0_4] : memref<8x256xf32, #tpu.memory_space<vmem>>, vector<8x256xf32>
    tpu.vector_store %arg2[%c0_3, %c0_4], %2 {strides = array<i32>} : memref<8x256xf32, #tpu.memory_space<vmem>>, vector<8x256xf32>,
    return
  }
}

</mosaic_0001>

<bundles_post_ra>
// kernel: tpu_custom_call.1
= control target key start
LH: loop header
LB: loop body
LE: loop exit
PB: predicated region body
PF: predicated region fallthrough
CT: control target
= control target key end

     0   :  { %7 = vsyncpa [#allocation3], 0  ;;  %s189_s0 = inlined_call_operand.hbm [shape: f32[8,256], index: 0, kind: input, shape index: {}]   ;;  %s190_s1 = inlined_call_operand.hbm [shape: f32[8,256], index: 1, kind: input, shape index: {}]   ;;  %s191_s2 = inlined_call_operand.hbm [shape: f32[8,256], index: 2, kind: output, shape index: {}]  }
   0x1   :  { %8 = vsyncpa [#allocation6], 0 }
   0x2   :  { %9 = vsyncpa [#allocation4], 0  ;;  %s135_s9 = smov [#allocation2]   ;;  %s136_s11 = smov [#allocation5]  }
   0x3   :  { %s16_s10 = sshll.u32 %s135_s9, 4  ;;  %s26_s12 = sshll.u32 %s136_s11, 4  ;;  %s17_s10 = int_to_ptr.vmem [resolvable:$true] %s16_s10  ;;  %s27_s12 = int_to_ptr.vmem [resolvable:$true] %s26_s12 }
   0x4   :  { %s63_s15 = scalar_lea.hbm %s189_s0, 256 }
   0x5   :  { %p64_p0 = scmp.ne.s32.totalorder %s189_s0, %s63_s15  ;;  %p67_p1 = scmp.lt.u32.totalorder %s63_s15, %s189_s0 }
   0x7   :  { %p69_p2 = pnand %p67_p1, %p64_p0 }
   0x9   :  { %72 = shalt.err (!%p69_p2)
}
   0xa   :  { %s73_s20 = scalar_lea.vmem %s17_s10, 256  ;;  %p78_p4 = scmp.lt.s32.totalorder %s17_s10, %s17_s10 }
   0xb   :  { %p74_p3 = scmp.ne.s32.totalorder %s17_s10, %s73_s20  ;;  %p79_p5 = scmp.lt.s32.totalorder %s73_s20, %s73_s20 }
   0xd   :  { %p80_p6 = por %p79_p5, %p78_p4 }
   0xf   :  { %p81_p7 = pnand %p80_p6, %p74_p3 }
  0x11   :  { %84 = shalt.err (!%p81_p7)
}
  0x12   :  { %19 = dma.hbm_to_vmem [thread:$0]  %s189_s0, 256, %s17_s10, [#allocation3]  }
  0x13   :  { %s85_s25 = scalar_lea.hbm %s190_s1, 256 }
  0x14   :  { %p86_p8 = scmp.ne.s32.totalorder %s190_s1, %s85_s25  ;;  %p89_p9 = scmp.lt.u32.totalorder %s85_s25, %s190_s1 }
  0x16   :  { %p91_p10 = pnand %p89_p9, %p86_p8 }
  0x18   :  { %94 = shalt.err (!%p91_p10)
}
  0x19   :  { %s95_s30 = scalar_lea.vmem %s27_s12, 256  ;;  %p100_p12 = scmp.lt.s32.totalorder %s27_s12, %s27_s12 }
  0x1a   :  { %p96_p11 = scmp.ne.s32.totalorder %s27_s12, %s95_s30  ;;  %p101_p13 = scmp.lt.s32.totalorder %s95_s30, %s95_s30 }
  0x1c   :  { %p102_p0 = por %p101_p13, %p100_p12 }
  0x1e   :  { %p103_p1 = pnand %p102_p0, %p96_p11 }
  0x20   :  { %106 = shalt.err (!%p103_p1)
}
  0x21   :  { %29 = dma.hbm_to_vmem [thread:$0]  %s190_s1, 256, %s27_s12, [#allocation6]  }
  0x22   :  { %129 = dma.done.wait [#allocation3], 256  }
  0x23   :  { %130 = vsyncadd [#allocation3], 4294967040 }
  0x24   :  { %131 = dma.done.wait [#allocation6], 256  }
  0x25   :  { %132 = vsyncadd [#allocation6], 4294967040  ;;  %s137_s4 = smov [#allocation7]   ;;  %v36_v0 = vld [vmem:[#allocation2] sm:$0xff]  ;;  %v38_v1 = vld [vmem:[#allocation5] sm:$0xff] }
  0x26   :  { %s50_s5 = sshll.u32 %s137_s4, 4  ;;  %v37_v2 = vld [vmem:[#allocation2 + $0x8] sm:$0xff]  ;;  %v40_v3 = vadd.f32 %v38_v1, %v36_v0  ;;  %v39_v4 = vld [vmem:[#allocation5 + $0x8] sm:$0xff]  ;;  %s51_s5 = int_to_ptr.vmem [resolvable:$true] %s50_s5 }
  0x27   :  { %v41_v5 = vadd.f32 %v39_v4, %v37_v2  ;;  %s107_s6 = scalar_lea.vmem %s51_s5, 256  ;;  %p112_p3 = scmp.lt.s32.totalorder %s51_s5, %s51_s5 }
  0x28   :  { %42 = vst [vmem:[#allocation7] sm:$0xff] %v40_v3  ;;  %p108_p2 = scmp.ne.s32.totalorder %s51_s5, %s107_s6  ;;  %p113_p4 = scmp.lt.s32.totalorder %s107_s6, %s107_s6 }
  0x29   :  { %43 = vst [vmem:[#allocation7 + $0x8] sm:$0xff] %v41_v5 }
  0x2a   :  { %p114_p5 = por %p113_p4, %p112_p3 }
  0x2c   :  { %p115_p6 = pnand %p114_p5, %p108_p2 }
  0x2e   :  { %118 = shalt.err (!%p115_p6)
}
  0x2f   :  { %s119_s8 = scalar_lea.hbm %s191_s2, 256 }
  0x30   :  { %p120_p7 = scmp.ne.s32.totalorder %s191_s2, %s119_s8  ;;  %p123_p8 = scmp.lt.u32.totalorder %s119_s8, %s191_s2 }
  0x32   :  { %p125_p9 = pnand %p123_p8, %p120_p7 }
  0x34   :  { %128 = shalt.err (!%p125_p9)
}
  0x35   :  { %53 = dma.vmem_to_hbm [thread:$0]  %s51_s5, 256, %s191_s2, [#allocation4]  }
  0x36   :  { %133 = dma.done.wait [#allocation4], 256  }
  0x37   :  { %134 = vsyncadd [#allocation4], 4294967040 }
  0x38   :  { %57 = vsyncpa [#allocation3], 1 }
  0x39   :  { %58 = vsyncpa [#allocation6], 1 }
  0x3a   :  { %59 = vsyncpa [#allocation4], 1 }

</bundles_post_ra>
